<compile_context>
chip_gen: v6e
topology: v6e:2x2x1
jax: 0.10.0
libtpu: 0.0.40
codegen_flags: <defaults>
</compile_context>

<pallas_src>
import functools

import jax
import jax.numpy as jnp
from jax import lax
from jax.experimental import pallas as pl
from jax.experimental.pallas import tpu as pltpu


def _elu(x):
    # exp is clamped so the untaken positive branch cannot overflow.
    return jnp.where(x > 0, x, jnp.exp(jnp.minimum(x, 0.0)) - 1.0)


def _round_up(a, m):
    return (a + m - 1) // m * m


# ---------------------------------------------------------------------------
# Fused per-layer Pallas kernel
# ---------------------------------------------------------------------------
def _tcn_layer_kernel(x_ref, w1_ref, w2_ref, vec_ref, *rest,
                      K, dilation, Lt, pad_al, has_res_conv):
    # x_ref : (Cin, Lt)       bf16 input tile (channels on sublanes, time on lanes)
    # w1_ref: (K, Cout, Cin)  bf16 conv1 taps (BN1 scale pre-folded)
    # w2_ref: (K, Cout, Cout) bf16 conv2 taps (BN2 scale pre-folded)
    # vec_ref:(Cout, 8)       f32 packed per-channel vectors: [shift1|shift2|br|0..]
    # wr_ref: (Cout, Cin)     bf16 1x1 residual conv (only if has_res_conv)
    # o_ref : (Cout, Lt)      bf16 output tile
    # xp_buf: (Cin,  pad_al+Lt) bf16 scratch: [.. causal halo | current x tile]
    # hp_buf: (Cout, pad_al+Lt) bf16 scratch: [.. causal halo | conv1 activations]
    if has_res_conv:
        wr_ref, o_ref, xp_buf, hp_buf = rest
    else:
        o_ref, xp_buf, hp_buf = rest

    pad = (K - 1) * dilation
    off = pad_al              # 128-aligned lane offset of the bulk tile
    base = pad_al - pad       # start of the causal halo (may be unaligned; tiny)
    j = pl.program_id(1)

    if pad > 0:
        @pl.when(j == 0)      # new batch element -> zero only the halo columns
        def _():
            xp_buf[:, base:off] = jnp.zeros((xp_buf.shape[0], pad), xp_buf.dtype)
            hp_buf[:, base:off] = jnp.zeros((hp_buf.shape[0], pad), hp_buf.dtype)

    x_bf = x_ref[...]                       # (Cin, Lt) bf16
    xp_buf[:, off:] = x_bf                  # lane-aligned, unmasked store

    # --- conv1 (causal, dilated; BN scale folded into w1) + shift + ELU ---
    acc = jnp.dot(w1_ref[0], xp_buf[:, base:base + Lt],
                  preferred_element_type=jnp.float32)
    for k in range(1, K):
        s = base + k * dilation
        acc = acc + jnp.dot(w1_ref[k], xp_buf[:, s:s + Lt],
                            preferred_element_type=jnp.float32)
    h = _elu(acc + vec_ref[:, 0:1])         # (Cout, Lt) f32

    hp_buf[:, off:] = h.astype(hp_buf.dtype)

    # --- conv2 (causal, dilated; BN scale folded into w2) + shift + ELU ---
    acc = jnp.dot(w2_ref[0], hp_buf[:, base:base + Lt],
                  preferred_element_type=jnp.float32)
    for k in range(1, K):
        s = base + k * dilation
        acc = acc + jnp.dot(w2_ref[k], hp_buf[:, s:s + Lt],
                            preferred_element_type=jnp.float32)
    y = _elu(acc + vec_ref[:, 1:2])

    # --- residual path + final ELU ---
    if has_res_conv:
        res = jnp.dot(wr_ref[...], x_bf,
                      preferred_element_type=jnp.float32) + vec_ref[:, 2:3]
    else:
        res = x_bf.astype(jnp.float32)      # identity residual, no matmul
    o_ref[...] = _elu(y + res).astype(o_ref.dtype)

    if pad > 0:   # carry the causal halo into the next L tile of this batch element
        xp_buf[:, base:off] = xp_buf[:, off + Lt - pad:off + Lt]
        hp_buf[:, base:off] = hp_buf[:, off + Lt - pad:off + Lt]


# ---------------------------------------------------------------------------
# Tiling helpers: generation-aware VMEM budget and L-tile selection
# ---------------------------------------------------------------------------
def _vmem_budget_bytes():
    try:
        cap = int(pltpu.get_tpu_info().vmem_capacity_bytes)
    except Exception:
        cap = 64 * 1024 * 1024          # conservative fallback (v7x-sized)
    # leave headroom for Mosaic internal scratch; never exceed 112 MiB
    return max(min(cap - 16 * 1024 * 1024, 112 * 1024 * 1024), 32 * 1024 * 1024)


def _pick_l_tile(L, pad, cin, cout, budget):
    """Largest 128-multiple L tile that fits the VMEM budget, covers the causal
    halo (Lt >= pad) and minimizes padding waste."""
    pad_al = _round_up(pad, 128) if pad > 0 else 0
    lt_min = max(128, _round_up(max(pad, 1), 128))
    l_al = max(_round_up(max(L, 1), 128), lt_min)
    cands = sorted({c for c in (128, 256, 384, 512, 768, 1024, 2048, 4096, l_al)
                    if lt_min <= c <= l_al})
    if not cands:
        cands = [lt_min]

    def fits(lt):
        need = (2 * (cin + cout) * lt * 2            # double-buffered in/out blocks (bf16)
                + (cin + cout) * (pad_al + lt) * 2)  # bf16 halo scratch
        return need <= budget // 2                   # headroom for weights / internals

    feasible = [c for c in cands if fits(c)] or [cands[0]]
    # minimize total padded length first, then prefer the larger tile
    return min(feasible, key=lambda c: (_round_up(max(L, 1), c), -c))


# ---------------------------------------------------------------------------
# pallas_call wrapper: grid = (batch, L tiles), halo carried across L tiles
# ---------------------------------------------------------------------------
def tcn_layer(x_ncl, p, dilation):
    N, cin, L = x_ncl.shape
    K, cout, _ = p["w1"].shape
    pad = (K - 1) * dilation
    budget = _vmem_budget_bytes()
    Lt = _pick_l_tile(L, pad, cin, cout, budget)
    pad_al = _round_up(pad, 128) if pad > 0 else 0
    L_pad = _round_up(L, Lt)
    n_l = L_pad // Lt
    has_res_conv = p["wr"] is not None

    x_bf = x_ncl.astype(jnp.bfloat16)
    if L_pad != L:
        # Right-padding is safe: the conv is causal, so padded (garbage) columns
        # never influence columns < L; they are sliced off below.
        x_bf = jnp.pad(x_bf, ((0, 0), (0, 0), (0, L_pad - L)))

    kernel = functools.partial(_tcn_layer_kernel, K=K, dilation=dilation,
                               Lt=Lt, pad_al=pad_al, has_res_conv=has_res_conv)

    in_specs = [
        pl.BlockSpec((None, cin, Lt), lambda n, j: (n, 0, j)),   # x tile (bf16)
        pl.BlockSpec((K, cout, cin), lambda n, j: (0, 0, 0)),    # w1 (scale folded)
        pl.BlockSpec((K, cout, cout), lambda n, j: (0, 0, 0)),   # w2 (scale folded)
        pl.BlockSpec((cout, 8), lambda n, j: (0, 0)),            # shift1|shift2|br
    ]
    args = [x_bf, p["w1"], p["w2"], p["vec"]]
    if has_res_conv:
        in_specs.append(pl.BlockSpec((cout, cin), lambda n, j: (0, 0)))   # wr
        args.append(p["wr"])

    y = pl.pallas_call(
        kernel,
        out_shape=jax.ShapeDtypeStruct((N, cout, L_pad), jnp.bfloat16),
        grid=(N, n_l),
        in_specs=in_specs,
        out_specs=pl.BlockSpec((None, cout, Lt), lambda n, j: (n, 0, j)),
        scratch_shapes=[pltpu.VMEM((cin, pad_al + Lt), jnp.bfloat16),
                        pltpu.VMEM((cout, pad_al + Lt), jnp.bfloat16)],
        compiler_params=pltpu.CompilerParams(
            # NOTE: the L axis MUST remain the last grid dim and "arbitrary"
            # (sequential) — the causal halo is carried across L tiles in VMEM
            # scratch per core.  Batch axis is parallel (megacore sharding).
            dimension_semantics=("parallel", "arbitrary"),
            vmem_limit_bytes=budget,
        ),
    )(*args)

    if L_pad != L:
        y = y[:, :, :L]
    return y
    # TODO(synk): v7x dual-TensorCore utilisation for batch=1 would need a second
    #             parallel L-superblock axis with halo recompute (not implemented).


def tcn_forward(x_ncl, params):
    x = x_ncl
    for i, p in enumerate(params):
        x = tcn_layer(x, p, 2 ** i)
    return x.astype(jnp.float32)


# ---------------------------------------------------------------------------
# Parameter init (deterministic; BN running stats + conv bias folded: scale is
# pre-multiplied into the bf16 conv weights, shift stays as a per-channel add)
# ---------------------------------------------------------------------------
def init_tcn_params(key, input_dim, depth, kernel_size, filters, eps=1e-5):
    params = []
    cur = input_dim
    for i in range(depth):
        k = jax.random.fold_in(key, i)
        ks = jax.random.split(k, 14)

        def _fold(bias, gamma, beta, mean, var):
            scale = gamma / jnp.sqrt(var + eps)
            shift = beta + (bias - mean) * scale
            return scale, shift

        w1_raw = 0.3 * jax.random.normal(ks[0], (kernel_size, filters, cur))
        b1 = 0.1 * jax.random.normal(ks[1], (filters,))
        g1 = 1.0 + 0.1 * jax.random.normal(ks[2], (filters,))
        be1 = 0.1 * jax.random.normal(ks[3], (filters,))
        m1 = 0.1 * jax.random.normal(ks[4], (filters,))
        v1 = 0.9 + 0.1 * jnp.abs(jax.random.normal(ks[5], (filters,)))
        scale1, shift1 = _fold(b1, g1, be1, m1, v1)
        w1 = (w1_raw * scale1[None, :, None]).astype(jnp.bfloat16)

        w2_raw = 0.3 * jax.random.normal(ks[6], (kernel_size, filters, filters))
        b2 = 0.1 * jax.random.normal(ks[7], (filters,))
        g2 = 1.0 + 0.1 * jax.random.normal(ks[8], (filters,))
        be2 = 0.1 * jax.random.normal(ks[9], (filters,))
        m2 = 0.1 * jax.random.normal(ks[10], (filters,))
        v2 = 0.9 + 0.1 * jnp.abs(jax.random.normal(ks[11], (filters,)))
        scale2, shift2 = _fold(b2, g2, be2, m2, v2)
        w2 = (w2_raw * scale2[None, :, None]).astype(jnp.bfloat16)

        if cur != filters:
            wr = (0.3 * jax.random.normal(ks[12], (filters, cur))).astype(jnp.bfloat16)
            br = 0.1 * jax.random.normal(ks[13], (filters,))
        else:
            wr, br = None, None     # PyTorch "res_conv is None" branch

        vec = jnp.zeros((filters, 8), jnp.float32)
        vec = vec.at[:, 0].set(shift1).at[:, 1].set(shift2)
        if br is not None:
            vec = vec.at[:, 2].set(br)

        params.append(dict(
            w1=w1, w2=w2, wr=wr, vec=vec,
            shift1=shift1.reshape(-1, 1), shift2=shift2.reshape(-1, 1),
            br=None if br is None else br.reshape(-1, 1)))
        cur = filters
    return params


# ---------------------------------------------------------------------------
# Pure-JAX reference (same regime: bf16 activations between layers, bf16 conv
# operands, f32 accumulation, BN scale folded into the bf16 weights)
# ---------------------------------------------------------------------------
def _ref_causal_conv(x_bf16, w_koc, dilation):
    K = w_koc.shape[0]
    pad = (K - 1) * dilation
    xp = jnp.pad(x_bf16, ((0, 0), (0, 0), (pad, 0)))
    w = jnp.transpose(w_koc, (1, 2, 0))  # (Cout, Cin, K) = OIW
    return lax.conv_general_dilated(
        xp, w, window_strides=(1,), padding="VALID", rhs_dilation=(dilation,),
        dimension_numbers=("NCW", "OIW", "NCW"),
        preferred_element_type=jnp.float32)


def ref_forward(x_ncl, params):
    x = x_ncl.astype(jnp.bfloat16)
    for i, p in enumerate(params):
        d = 2 ** i
        h = _elu(_ref_causal_conv(x, p["w1"], d) + p["shift1"][None])
        y = _elu(_ref_causal_conv(h.astype(jnp.bfloat16), p["w2"], d)
                 + p["shift2"][None])
        if p["wr"] is not None:
            res = jnp.einsum("oc,ncl->nol", p["wr"], x,
                             preferred_element_type=jnp.float32) + p["br"][None]
        else:
            res = x.astype(jnp.float32)
        x = _elu(y + res).astype(jnp.bfloat16)
    return x.astype(jnp.float32)


# ---------------------------------------------------------------------------
if __name__ == "__main__":
    key = jax.random.PRNGKey(0)
    N, C_IN, L = 2, 4, 16
    DEPTH, KSZ, FILTERS = 2, 3, 8
    DROPOUT = 0.1  # inference mode -> identity
    # TODO(synk): train-mode dropout RNG and batch-statistic BatchNorm are not
    #             implemented (inference semantics: running stats folded).

    params = init_tcn_params(key, C_IN, DEPTH, KSZ, FILTERS)
    x = jax.random.normal(jax.random.fold_in(key, 999), (N, C_IN, L), jnp.float32)

    out = jax.block_until_ready(tcn_forward(x, params))
    assert out.shape == (N, FILTERS, L), out.shape

    ref = ref_forward(x, params)
    max_err = float(jnp.max(jnp.abs(out - ref)))
    assert max_err < 3e-2, f"mismatch vs reference: {max_err}"

    print("KERNEL_OK")
</pallas_src>

<mosaic_0001>
module attributes {stable_mosaic.version = 11 : i64} {
  func.func @_tcn_layer_kernel(%arg0: i32, %arg1: i32, %arg2: memref<1x4x128xbf16, #tpu.memory_space<vmem>>, %arg3: memref<3x8x4xbf16, #tpu.memory_space<vmem>>, %arg4: memref<3x8x8xbf16, #tpu.memory_space<vmem>>, %arg5: memref<8x8xf32, #tpu.memory_space<vmem>>, %arg6: memref<8x4xbf16, #tpu.memory_space<vmem>>, %arg7: memref<1x8x128xbf16, #tpu.memory_space<vmem>>, %arg8: memref<4x256xbf16, #tpu.memory_space<vmem>>, %arg9: memref<8x256xbf16, #tpu.memory_space<vmem>>) attributes {dimension_semantics = [#tpu.dimension_semantics<parallel>, #tpu.dimension_semantics<arbitrary>], iteration_bounds = array<i64: 2, 1>, scalar_prefetch = 0 : i64, scratch_operands = 2 : i64, tpu.core_type = #tpu.core_type<tc>, window_params = [{transform_indices = @transform_0, window_bounds = array<i64: 1, 4, 128>}, {pipeline_mode = #tpu.pipeline_mode<synchronous>, transform_indices = @transform_1, window_bounds = array<i64: 3, 8, 4>}, {pipeline_mode = #tpu.pipeline_mode<synchronous>, transform_indices = @transform_2, window_bounds = array<i64: 3, 8, 8>}, {pipeline_mode = #tpu.pipeline_mode<synchronous>, transform_indices = @transform_3, window_bounds = array<i64: 8, 8>}, {pipeline_mode = #tpu.pipeline_mode<synchronous>, transform_indices = @transform_4, window_bounds = array<i64: 8, 4>}, {transform_indices = @transform_5, window_bounds = array<i64: 1, 8, 128>}]} {
    %c0_i32 = arith.constant 0 : i32
    %0 = arith.cmpi eq, %arg1, %c0_i32 : i32
    %1 = arith.extui %0 : i1 to i32
    %c0_i32_0 = arith.constant 0 : i32
    %2 = arith.cmpi ne, %1, %c0_i32_0 : i32
    scf.if %2 {
      %cst_65 = arith.constant 0.000000e+00 : bf16
      %80 = vector.broadcast %cst_65 : bf16 to vector<4x2xbf16>
      %c0_66 = arith.constant 0 : index
      %c126_67 = arith.constant 126 : index
      %81 = vector.load %arg8[%c0_66, %c126_67] : memref<4x256xbf16, #tpu.memory_space<vmem>>, vector<4x2xbf16>
      tpu.vector_store %arg8[%c0_66, %c126_67], %80 {strides = array<i32>} : memref<4x256xbf16, #tpu.memory_space<vmem>>, vector<4x2xbf16>,
      %cst_68 = arith.constant 0.000000e+00 : bf16
      %82 = vector.broadcast %cst_68 : bf16 to vector<8x2xbf16>
      %c0_69 = arith.constant 0 : index
      %c126_70 = arith.constant 126 : index
      %83 = vector.load %arg9[%c0_69, %c126_70] : memref<8x256xbf16, #tpu.memory_space<vmem>>, vector<8x2xbf16>
      tpu.vector_store %arg9[%c0_69, %c126_70], %82 {strides = array<i32>} : memref<8x256xbf16, #tpu.memory_space<vmem>>, vector<8x2xbf16>,
    } else {
    }
    %c0 = arith.constant 0 : index
    %c0_1 = arith.constant 0 : index
    %c0_2 = arith.constant 0 : index
    %3 = vector.load %arg2[%c0, %c0_1, %c0_2] : memref<1x4x128xbf16, #tpu.memory_space<vmem>>, vector<1x4x128xbf16>
    %4 = vector.shape_cast %3 : vector<1x4x128xbf16> to vector<4x128xbf16>
    %c0_3 = arith.constant 0 : index
    %c128 = arith.constant 128 : index
    %5 = vector.load %arg8[%c0_3, %c128] : memref<4x256xbf16, #tpu.memory_space<vmem>>, vector<4x128xbf16>
    tpu.vector_store %arg8[%c0_3, %c128], %4 {strides = array<i32>} : memref<4x256xbf16, #tpu.memory_space<vmem>>, vector<4x128xbf16>,
    %c0_4 = arith.constant 0 : index
    %c0_5 = arith.constant 0 : index
    %c0_6 = arith.constant 0 : index
    %6 = vector.load %arg3[%c0_4, %c0_5, %c0_6] : memref<3x8x4xbf16, #tpu.memory_space<vmem>>, vector<1x8x4xbf16>
    %7 = vector.shape_cast %6 : vector<1x8x4xbf16> to vector<8x4xbf16>
    %c0_7 = arith.constant 0 : index
    %c126 = arith.constant 126 : index
    %8 = vector.load %arg8[%c0_7, %c126] : memref<4x256xbf16, #tpu.memory_space<vmem>>, vector<4x128xbf16>
    %cst = arith.constant dense<0.000000e+00> : vector<8x128xf32>
    %9 = tpu.matmul %7, %8, %cst {dimension_numbers = #tpu.dot_dimension_numbers<[1], [0], [0], [1], [0, 0, 1, 1], [], []>} : vector<8x4xbf16>, vector<4x128xbf16>, vector<8x128xf32> -> vector<8x128xf32>
    %c1 = arith.constant 1 : index
    %c0_8 = arith.constant 0 : index
    %c0_9 = arith.constant 0 : index
    %10 = vector.load %arg3[%c1, %c0_8, %c0_9] : memref<3x8x4xbf16, #tpu.memory_space<vmem>>, vector<1x8x4xbf16>
    %11 = vector.shape_cast %10 : vector<1x8x4xbf16> to vector<8x4xbf16>
    %c0_10 = arith.constant 0 : index
    %c127 = arith.constant 127 : index
    %12 = vector.load %arg8[%c0_10, %c127] : memref<4x256xbf16, #tpu.memory_space<vmem>>, vector<4x128xbf16>
    %cst_11 = arith.constant dense<0.000000e+00> : vector<8x128xf32>
    %13 = tpu.matmul %11, %12, %cst_11 {dimension_numbers = #tpu.dot_dimension_numbers<[1], [0], [0], [1], [0, 0, 1, 1], [], []>} : vector<8x4xbf16>, vector<4x128xbf16>, vector<8x128xf32> -> vector<8x128xf32>
    %14 = arith.addf %9, %13 : vector<8x128xf32>
    %c2 = arith.constant 2 : index
    %c0_12 = arith.constant 0 : index
    %c0_13 = arith.constant 0 : index
    %15 = vector.load %arg3[%c2, %c0_12, %c0_13] : memref<3x8x4xbf16, #tpu.memory_space<vmem>>, vector<1x8x4xbf16>
    %16 = vector.shape_cast %15 : vector<1x8x4xbf16> to vector<8x4xbf16>
    %c0_14 = arith.constant 0 : index
    %c128_15 = arith.constant 128 : index
    %17 = vector.load %arg8[%c0_14, %c128_15] : memref<4x256xbf16, #tpu.memory_space<vmem>>, vector<4x128xbf16>
    %cst_16 = arith.constant dense<0.000000e+00> : vector<8x128xf32>
    %18 = tpu.matmul %16, %17, %cst_16 {dimension_numbers = #tpu.dot_dimension_numbers<[1], [0], [0], [1], [0, 0, 1, 1], [], []>} : vector<8x4xbf16>, vector<4x128xbf16>, vector<8x128xf32> -> vector<8x128xf32>
    %19 = arith.addf %14, %18 : vector<8x128xf32>
    %c0_17 = arith.constant 0 : index
    %c0_18 = arith.constant 0 : index
    %20 = vector.load %arg5[%c0_17, %c0_18] : memref<8x8xf32, #tpu.memory_space<vmem>>, vector<8x1xf32>
    %21 = vector.broadcast %20 : vector<8x1xf32> to vector<8x128xf32>
    %22 = arith.addf %19, %21 : vector<8x128xf32>
    %cst_19 = arith.constant 0.000000e+00 : f32
    %23 = vector.broadcast %cst_19 : f32 to vector<8x128xf32>
    %24 = arith.cmpf ogt, %22, %23 : vector<8x128xf32>
    %cst_20 = arith.constant 0.000000e+00 : f32
    %25 = vector.broadcast %cst_20 : f32 to vector<8x128xf32>
    %26 = arith.minimumf %22, %25 : vector<8x128xf32>
    %27 = math.exp %26 : vector<8x128xf32>
    %cst_21 = arith.constant 1.000000e+00 : f32
    %28 = vector.broadcast %cst_21 : f32 to vector<8x128xf32>
    %29 = arith.subf %27, %28 : vector<8x128xf32>
    %30 = arith.select %24, %22, %29 : vector<8x128xi1>, vector<8x128xf32>
    %31 = arith.truncf %30 : vector<8x128xf32> to vector<8x128xbf16>
    %c0_22 = arith.constant 0 : index
    %c128_23 = arith.constant 128 : index
    %32 = vector.load %arg9[%c0_22, %c128_23] : memref<8x256xbf16, #tpu.memory_space<vmem>>, vector<8x128xbf16>
    tpu.vector_store %arg9[%c0_22, %c128_23], %31 {strides = array<i32>} : memref<8x256xbf16, #tpu.memory_space<vmem>>, vector<8x128xbf16>,
    %c0_24 = arith.constant 0 : index
    %c0_25 = arith.constant 0 : index
    %c0_26 = arith.constant 0 : index
    %33 = vector.load %arg4[%c0_24, %c0_25, %c0_26] : memref<3x8x8xbf16, #tpu.memory_space<vmem>>, vector<1x8x8xbf16>
    %34 = vector.shape_cast %33 : vector<1x8x8xbf16> to vector<8x8xbf16>
    %c0_27 = arith.constant 0 : index
    %c126_28 = arith.constant 126 : index
    %35 = vector.load %arg9[%c0_27, %c126_28] : memref<8x256xbf16, #tpu.memory_space<vmem>>, vector<8x128xbf16>
    %cst_29 = arith.constant dense<0.000000e+00> : vector<8x128xf32>
    %36 = tpu.matmul %34, %35, %cst_29 {dimension_numbers = #tpu.dot_dimension_numbers<[1], [0], [0], [1], [0, 0, 1, 1], [], []>} : vector<8x8xbf16>, vector<8x128xbf16>, vector<8x128xf32> -> vector<8x128xf32>
    %c1_30 = arith.constant 1 : index
    %c0_31 = arith.constant 0 : index
    %c0_32 = arith.constant 0 : index
    %37 = vector.load %arg4[%c1_30, %c0_31, %c0_32] : memref<3x8x8xbf16, #tpu.memory_space<vmem>>, vector<1x8x8xbf16>
    %38 = vector.shape_cast %37 : vector<1x8x8xbf16> to vector<8x8xbf16>
    %c0_33 = arith.constant 0 : index
    %c127_34 = arith.constant 127 : index
    %39 = vector.load %arg9[%c0_33, %c127_34] : memref<8x256xbf16, #tpu.memory_space<vmem>>, vector<8x128xbf16>
    %cst_35 = arith.constant dense<0.000000e+00> : vector<8x128xf32>
    %40 = tpu.matmul %38, %39, %cst_35 {dimension_numbers = #tpu.dot_dimension_numbers<[1], [0], [0], [1], [0, 0, 1, 1], [], []>} : vector<8x8xbf16>, vector<8x128xbf16>, vector<8x128xf32> -> vector<8x128xf32>
    %41 = arith.addf %36, %40 : vector<8x128xf32>
    %c2_36 = arith.constant 2 : index
    %c0_37 = arith.constant 0 : index
    %c0_38 = arith.constant 0 : index
    %42 = vector.load %arg4[%c2_36, %c0_37, %c0_38] : memref<3x8x8xbf16, #tpu.memory_space<vmem>>, vector<1x8x8xbf16>
    %43 = vector.shape_cast %42 : vector<1x8x8xbf16> to vector<8x8xbf16>
    %c0_39 = arith.constant 0 : index
    %c128_40 = arith.constant 128 : index
    %44 = vector.load %arg9[%c0_39, %c128_40] : memref<8x256xbf16, #tpu.memory_space<vmem>>, vector<8x128xbf16>
    %cst_41 = arith.constant dense<0.000000e+00> : vector<8x128xf32>
    %45 = tpu.matmul %43, %44, %cst_41 {dimension_numbers = #tpu.dot_dimension_numbers<[1], [0], [0], [1], [0, 0, 1, 1], [], []>} : vector<8x8xbf16>, vector<8x128xbf16>, vector<8x128xf32> -> vector<8x128xf32>
    %46 = arith.addf %41, %45 : vector<8x128xf32>
    %c0_42 = arith.constant 0 : index
    %c1_43 = arith.constant 1 : index
    %47 = vector.load %arg5[%c0_42, %c1_43] : memref<8x8xf32, #tpu.memory_space<vmem>>, vector<8x1xf32>
    %48 = vector.broadcast %47 : vector<8x1xf32> to vector<8x128xf32>
    %49 = arith.addf %46, %48 : vector<8x128xf32>
    %cst_44 = arith.constant 0.000000e+00 : f32
    %50 = vector.broadcast %cst_44 : f32 to vector<8x128xf32>
    %51 = arith.cmpf ogt, %49, %50 : vector<8x128xf32>
    %cst_45 = arith.constant 0.000000e+00 : f32
    %52 = vector.broadcast %cst_45 : f32 to vector<8x128xf32>
    %53 = arith.minimumf %49, %52 : vector<8x128xf32>
    %54 = math.exp %53 : vector<8x128xf32>
    %cst_46 = arith.constant 1.000000e+00 : f32
    %55 = vector.broadcast %cst_46 : f32 to vector<8x128xf32>
    %56 = arith.subf %54, %55 : vector<8x128xf32>
    %57 = arith.select %51, %49, %56 : vector<8x128xi1>, vector<8x128xf32>
    %c0_47 = arith.constant 0 : index
    %c0_48 = arith.constant 0 : index
    %58 = vector.load %arg6[%c0_47, %c0_48] : memref<8x4xbf16, #tpu.memory_space<vmem>>, vector<8x4xbf16>
    %cst_49 = arith.constant dense<0.000000e+00> : vector<8x128xf32>
    %59 = tpu.matmul %58, %4, %cst_49 {dimension_numbers = #tpu.dot_dimension_numbers<[1], [0], [0], [1], [0, 0, 1, 1], [], []>} : vector<8x4xbf16>, vector<4x128xbf16>, vector<8x128xf32> -> vector<8x128xf32>
    %c0_50 = arith.constant 0 : index
    %c2_51 = arith.constant 2 : index
    %60 = vector.load %arg5[%c0_50, %c2_51] : memref<8x8xf32, #tpu.memory_space<vmem>>, vector<8x1xf32>
    %61 = vector.broadcast %60 : vector<8x1xf32> to vector<8x128xf32>
    %62 = arith.addf %59, %61 : vector<8x128xf32>
    %63 = arith.addf %57, %62 : vector<8x128xf32>
    %cst_52 = arith.constant 0.000000e+00 : f32
    %64 = vector.broadcast %cst_52 : f32 to vector<8x128xf32>
    %65 = arith.cmpf ogt, %63, %64 : vector<8x128xf32>
    %cst_53 = arith.constant 0.000000e+00 : f32
    %66 = vector.broadcast %cst_53 : f32 to vector<8x128xf32>
    %67 = arith.minimumf %63, %66 : vector<8x128xf32>
    %68 = math.exp %67 : vector<8x128xf32>
    %cst_54 = arith.constant 1.000000e+00 : f32
    %69 = vector.broadcast %cst_54 : f32 to vector<8x128xf32>
    %70 = arith.subf %68, %69 : vector<8x128xf32>
    %71 = arith.select %65, %63, %70 : vector<8x128xi1>, vector<8x128xf32>
    %72 = arith.truncf %71 : vector<8x128xf32> to vector<8x128xbf16>
    %c0_55 = arith.constant 0 : index
    %c0_56 = arith.constant 0 : index
    %c0_57 = arith.constant 0 : index
    %73 = vector.load %arg7[%c0_55, %c0_56, %c0_57] : memref<1x8x128xbf16, #tpu.memory_space<vmem>>, vector<1x8x128xbf16>
    %74 = vector.shape_cast %73 : vector<1x8x128xbf16> to vector<8x128xbf16>
    %75 = vector.shape_cast %72 : vector<8x128xbf16> to vector<1x8x128xbf16>
    tpu.vector_store %arg7[%c0_55, %c0_56, %c0_57], %75 {strides = array<i32>} : memref<1x8x128xbf16, #tpu.memory_space<vmem>>, vector<1x8x128xbf16>,
    %c0_58 = arith.constant 0 : index
    %c254 = arith.constant 254 : index
    %76 = vector.load %arg8[%c0_58, %c254] : memref<4x256xbf16, #tpu.memory_space<vmem>>, vector<4x2xbf16>
    %c0_59 = arith.constant 0 : index
    %c126_60 = arith.constant 126 : index
    %77 = vector.load %arg8[%c0_59, %c126_60] : memref<4x256xbf16, #tpu.memory_space<vmem>>, vector<4x2xbf16>
    tpu.vector_store %arg8[%c0_59, %c126_60], %76 {strides = array<i32>} : memref<4x256xbf16, #tpu.memory_space<vmem>>, vector<4x2xbf16>,
    %c0_61 = arith.constant 0 : index
    %c254_62 = arith.constant 254 : index
    %78 = vector.load %arg9[%c0_61, %c254_62] : memref<8x256xbf16, #tpu.memory_space<vmem>>, vector<8x2xbf16>
    %c0_63 = arith.constant 0 : index
    %c126_64 = arith.constant 126 : index
    %79 = vector.load %arg9[%c0_63, %c126_64] : memref<8x256xbf16, #tpu.memory_space<vmem>>, vector<8x2xbf16>
    tpu.vector_store %arg9[%c0_63, %c126_64], %78 {strides = array<i32>} : memref<8x256xbf16, #tpu.memory_space<vmem>>, vector<8x2xbf16>,
    return
  }
  func.func @transform_0(%arg0: i32, %arg1: i32) -> (i32, i32, i32) {
    %c0_i32 = arith.constant 0 : i32
    %c0_i32_0 = arith.constant 0 : i32
    return %arg0, %c0_i32, %arg1 : i32, i32, i32
  }
  func.func @transform_1(%arg0: i32, %arg1: i32) -> (i32, i32, i32) {
    %c0_i32 = arith.constant 0 : i32
    %c0_i32_0 = arith.constant 0 : i32
    %c0_i32_1 = arith.constant 0 : i32
    %c0_i32_2 = arith.constant 0 : i32
    return %c0_i32, %c0_i32_0, %c0_i32_1 : i32, i32, i32
  }
  func.func @transform_2(%arg0: i32, %arg1: i32) -> (i32, i32, i32) {
    %c0_i32 = arith.constant 0 : i32
    %c0_i32_0 = arith.constant 0 : i32
    %c0_i32_1 = arith.constant 0 : i32
    %c0_i32_2 = arith.constant 0 : i32
    return %c0_i32, %c0_i32_0, %c0_i32_1 : i32, i32, i32
  }
  func.func @transform_3(%arg0: i32, %arg1: i32) -> (i32, i32) {
    %c0_i32 = arith.constant 0 : i32
    %c0_i32_0 = arith.constant 0 : i32
    %c0_i32_1 = arith.constant 0 : i32
    return %c0_i32, %c0_i32_0 : i32, i32
  }
  func.func @transform_4(%arg0: i32, %arg1: i32) -> (i32, i32) {
    %c0_i32 = arith.constant 0 : i32
    %c0_i32_0 = arith.constant 0 : i32
    %c0_i32_1 = arith.constant 0 : i32
    return %c0_i32, %c0_i32_0 : i32, i32
  }
  func.func @transform_5(%arg0: i32, %arg1: i32) -> (i32, i32, i32) {
    %c0_i32 = arith.constant 0 : i32
    %c0_i32_0 = arith.constant 0 : i32
    return %arg0, %c0_i32, %arg1 : i32, i32, i32
  }
}

</mosaic_0001>

<bundles_post_ra>
// kernel: tpu_custom_call.1
= control target key start
LH: loop header
LB: loop body
LE: loop exit
PB: predicated region body
PF: predicated region fallthrough
CT: control target
= control target key end

     0   :  { %10 = vsyncpa [#allocation5], 0  ;;  %s1221_s0 = inlined_call_operand.vmem [shape: bf16[2,4,128], index: 0, kind: input, shape index: {}]   ;;  %s1222_s1 = inlined_call_operand.vmem [shape: bf16[3,8,4], index: 1, kind: input, shape index: {}]   ;;  %s1223_s2 = inlined_call_operand.vmem [shape: bf16[3,8,8], index: 2, kind: input, shape index: {}]   ;;  %s1224_s3 = inlined_call_operand.vmem [shape: f32[8,8], index: 3, kind: input, shape index: {}]   ;;  %s1225_s4 = inlined_call_operand.vmem [shape: bf16[8,4], index: 4, kind: input, shape index: {}]   ;;  %s1226_s5 = inlined_call_operand.hbm [shape: bf16[2,8,128], index: 5, kind: output, shape index: {}]  }
   0x1   :  { %12 = vsyncpa [#allocation5 + $0x1], 0  ;;  %s1041_s18 = smov 0   ;;  %s1043_s19 = smov 0  }
   0x2   :  { %s1045_s20 = smov 0   ;;  %s1047_s21 = smov 0  }
   0x3   :  { %s1049_s22 = smov 0   ;;  %s1051_s23 = smov 0  }
   0x4 LB: > { %s768_s24 = sadd.s32 4294967295, %s1001_s23   ;;  %s769_s25 = sadd.s32 4294967294, %s1001_s23   ;;  %s1001_s23 = sphi %s1051_s23, %s18_s23   ;;  %s997_s22 = sphi %s1049_s22, %s1233_s22   ;;  %s993_s21 = sphi %s1047_s21, %s1232_s21   ;;  %s989_s20 = sphi %s1045_s20, %s1231_s20   ;;  %s985_s19 = sphi %s1043_s19, %s1230_s19   ;;  %s981_s18 = sphi %s1041_s18, %s1229_s18  }
   0x5   : > { %s30_s26 = sadd.s32 1, %s997_s22  ;;  %s151_s27 = sadd.s32 1, %s989_s20 }
   0x6   : > { %p32_p0 = scmp.ge.s32.totalorder %s30_s26, 2  ;;  %p161_p1 = scmp.ne.s32.totalorder %s989_s20, %s985_s19 }
   0x7   : > { %p162_p2 = scmp.eq.s32.totalorder %s768_s24, 1  ;;  %p167_p3 = scmp.ne.s32.totalorder %s985_s19, %s981_s18 }
   0x8   : > { %s1235_s26 = smov (%p32_p0, %s30_s26), 0  ;;  %p168_p5 = scmp.eq.s32.totalorder %s769_s25, 1 }
   0x9   : > { %p1081_p4 = por %p162_p2, %p161_p1  ;;  %s146_s29 = ssub.s32 %s997_s22, %s1235_s26 }
   0xa   : > { %p772_p6 = scmp.ge.s32.totalorder %s1001_s23, 1  ;;  %p149_p7 = scmp.eq.s32.totalorder %s146_s29, 0 }
   0xb   : > { %p1088_p8 = por %p168_p5, %p167_p3  ;;  %p208_p9 = scmp.lt.s32.totalorder %s1001_s23, 3 }
   0xc   : > { %s1094_s6 = scalar_select %p149_p7, %s989_s20, %s151_s27  }
   0xd   : > { %p209_p10 = pnand %p772_p6, %p208_p9 }
   0xe   : > { %p238_p11 = scmp.lt.s32.totalorder (!%p209_p10), %s993_s21, 1  ;;  %s1006_s12 = smov (!%p209_p10), 2  }
   0xf   : > { %212 = sbr.rel (%p209_p10) target bundleno = 783 (0x30f), region = 40  ;;  %s1007_s13 = smov (!%p209_p10), 1  }
  0x10   : > { %s235_s15 = sand.u32 (!%p209_p10), 1, %s985_s19   ;;  %s793_s17 = sshll.u32 (!%p209_p10), %s993_s21, 6 }
  0x11   : > { %s773_s16 = sshll.u32 (!%p209_p10), %s235_s15, 2  ;;  %s1010_s10 = smov (!%p209_p10), [#allocation4]  }
  0x12   : > { %s237_s24 = scalar_lea.vmem (!%p209_p10), [#allocation4], %s773_s16 }
  0x13   : > { %s697_s25 = sshll.u32 (!%p209_p10), %s237_s24, 4  ;;  %s698_s25 = int_to_ptr.vmem [resolvable:$true] %s697_s25 }
  0x14   : > { %vm250_vm0 = vcmask 1042416   ;;  %v1003_v0 = vmov 0   ;;  %s239_s7 = scalar_select %p238_p11, %s993_s21, 1  ;;  %v1004_v2 = vmov 0.0   ;;  %vm1005_vm1 = vmmov 0   ;;  %v1119_v6 = vld [vmem:[%s1224_s3] sm:$0xff] }
  0x15   : > { %251 = vst.msk [vmem:[#allocation2] sm:$0x3] %vm250_vm0, %v1003_v0  ;;  %914 = vset.pattern.permute.xlu0 %v1003_v0  ;;  %810 = vmatprep.subr.bf16.mxu0 %v1004_v2  ;;  %vm273_vm2 = vcmask 7168   ;;  %vm327_vm3 = vcmask 15360   ;;  %vm279_vm4 = vcmask 1041408   ;;  %vm275_vm5 = vcmask 31744  }
  0x16   : > { %s774_s8 = sshll.u32 %s239_s7, 1  ;;  %816 = vmatprep.subr.bf16.mxu1 %v1004_v2  ;;  %812 = vmatprep.mubr.msk.bf16.mxu0 %vm1005_vm1, %v1004_v2  ;;  %v775_v16 = vld [vmem:[%s1222_s1 + $0x4] sm:$0xf]  ;;  %v256_v17 = vld [vmem:[%s1222_s1] sm:$0xf]  ;;  %vm252_vm6 = vcmask 1044464   ;;  %s695_s7 = scalar_lea.hbm %s1226_s5, %s793_s17 }
  0x17   : > { %s244_s11 = scalar_lea.vmem %s1221_s0, %s774_s8  ;;  %818 = vmatprep.mubr.msk.bf16.mxu1 %vm1005_vm1, %v1004_v2  ;;  %v779_v19 = vld [vmem:[%s1222_s1 + $0x8] sm:$0xf]  ;;  %253 = vst.msk [vmem:[#allocation3] sm:$0xf] %vm252_vm6, %v1003_v0  ;;  %v1008_v46 = vmov 1   ;;  %v1009_v47 = vmov 2  }
  0x18   : > { %v1102_v1 = vld [vmem:[%s244_s11] sm:$0x3]  ;;  %916 = vset.pattern.permute.xlu1 %v1009_v47  ;;  %vm458_vm8 = vcmask 1043456   ;;  %v782_v52 = vld [vmem:[%s1223_s2 + $0x4] sm:$0xf]  ;;  %vm454_vm9 = vcmask 64512  }
  0x19   : > { %255 = vst [vmem:[#allocation2 + $0x2] sm:$0x3] %v1102_v1  ;;  %v440_v59 = vld [vmem:[%s1223_s2] sm:$0xf]  ;;  %v625_v60 = vsel %vm279_vm4, %v1102_v1, 0  ;;  %s683_s8 = scalar_lea.sflag [#allocation5], %s235_s15 }
  0x1a   : > { %v787_v61 = vld [vmem:[%s1223_s2 + $0x8] sm:$0xf]  ;;  %v616_v62 = vld [vmem:[%s1225_s4] sm:$0xf]  ;;  %s925_s9 = scalar_lea.vmem %s698_s25, 64  ;;  %s929_s11 = sshll.u32 %s1010_s10, 4  ;;  %s930_s11 = int_to_ptr.vmem [resolvable:$false] %s929_s11 }
  0x1b   : > { %p926_p12 = scmp.ne.s32.totalorder %s698_s25, %s925_s9  ;;  %s931_s21 = scalar_lea.vmem %s930_s11, 128 }
  0x1c   : > { %p932_p1 = scmp.lt.s32.totalorder %s698_s25, %s930_s11  ;;  %p933_p2 = scmp.lt.s32.totalorder %s931_s21, %s925_s9 }
  0x1d   : > { %p927_p13 = pnand %p926_p12, %p1081_p4 }
  0x1e   : > { %p934_p3 = por %p933_p2, %p932_p1 }
  0x1f   : > { %p928_p0 = pneg %p927_p13 }
  0x20   : > { %v776_v3 = vld.sshfl [vmem:[#allocation2] sm:$0x33 pattern:$0x76325410] }
  0x21   : > { %v676_v4 = vld [vmem:[#allocation2 + $0x2] sm:$0x3]  ;;  %323 = vrot.lane.b32.xlu1 %v776_v3, %s1006_s12  ;;  %269 = vrot.lane.b32.xlu0 %v776_v3, %s1007_s13  ;;  %v268_v5 = vcombine.high %v776_v3, %v776_v3  ;;  %p935_p5 = pnand %p934_p3, %p928_p0 }
  0x22   : > { %678 = vst.msk [vmem:[#allocation2] sm:$0x3] %vm250_vm0, %v676_v4  ;;  %v377_v13 = vld [vmem:[#allocation2 + $0x2] sm:$0x3] }
  0x23   : > { %v382_v18 = vsel %vm279_vm4, %v377_v13, 0 }
  0x25   : > { %325 = vrot.lane.b32.xlu1 %v268_v5, %s1006_s12  ;;  %271 = vrot.lane.b32.xlu0 %v268_v5, %s1007_s13 }
  0x29   : > { %428 = vperm.xlu0 %914, %v1119_v6  }
  0x2d   : > { %915 = vset.pattern.permute.xlu0 %v1008_v46 }
  0x93   : > { %v324_v7 = vpop.permute.xlu1 %323  ;;  %v270_v8 = vpop.permute.xlu0 %269 }
  0x97   : > { %v326_v9 = vpop.permute.xlu1 %325  ;;  %v272_v10 = vpop.permute.xlu0 %271 }
  0x98   : > { %v274_v11 = vsel %vm273_vm2, %v270_v8, %v272_v10  ;;  %v328_v12 = vsel %vm327_vm3, %v324_v7, %v326_v9 }
  0x99   : > { %v281_v14 = vsel %vm279_vm4, %v274_v11, 0  ;;  %v333_v15 = vsel %vm279_vm4, %v328_v12, 0 }
  0x9a   : > { %811 = vmatpush3.bf16.msra.mxu0 %v281_v14  ;;  %817 = vmatpush3.bf16.msra.mxu1 %v333_v15 }
  0x9b   : > { %822 = vmatprep.subr.bf16.mxu0 %v1004_v2  ;;  %828 = vmatprep.subr.bf16.mxu1 %v1004_v2 }
  0x9d   : > { %813 = vmatmul.mubr.msk.bf16.vlgmr.msra.gmra.mxu0 %vm275_vm5, %v775_v16  ;;  %819 = vmatmul.mubr.msk.bf16.vlgmr.msra.gmra.mxu1 %vm275_vm5, %v256_v17 }
  0x9e   : > { %823 = vmatpush3.bf16.msra.mxu0 %v382_v18  ;;  %824 = vmatprep.mubr.msk.bf16.mxu0 %vm1005_vm1, %v1004_v2 }
  0x9f   : > { %830 = vmatprep.mubr.msk.bf16.mxu1 %vm1005_vm1, %v1004_v2  ;;  %834 = vmatprep.subr.bf16.mxu0 %v1004_v2 }
  0xa4   : > { %v429_v30 = vpop.permute.xlu0 %428 }
  0xa5   : > { %825 = vmatmul.mubr.msk.bf16.vlgmr.msra.gmra.mxu0 %vm275_vm5, %v779_v19 }
  0xa6   : > { %836 = vmatprep.mubr.msk.bf16.mxu0 %vm1005_vm1, %v1004_v2 }
 0x15d   : > { %v317_v20 = vpop.f32.mrf.mxu0  ;;  %v369_v21 = vpop.f32.mrf.mxu1 }
 0x15e   : > { %v370_v28 = vadd.f32 %v369_v21, %v317_v20 }
 0x15f   : > { %v814_v22 = vpop.f32.mrf.mxu0  ;;  %v820_v23 = vpop.f32.mrf.mxu1 }
 0x161   : > { %v320_v24 = vpop.f32.mrf.mxu0  ;;  %v372_v25 = vpop.f32.mrf.mxu1 }
 0x163   : > { %v815_v26 = vpop.f32.mrf.mxu0  ;;  %v821_v27 = vpop.f32.mrf.mxu1 }
 0x165   : > { %v418_v29 = vpop.f32.mrf.mxu0 }
 0x166   : > { %v424_v31 = vadd.f32 %v418_v29, %v370_v28 }
 0x167   : > { %v826_v32 = vpop.f32.mrf.mxu0 }
 0x168   : > { %v431_v33 = vadd.f32 %v429_v30, %v424_v31 }
 0x169   : > { %v421_v34 = vpop.f32.mrf.mxu0 }
 0x16a   : > { %v433_v35 = vmin.f32 %v431_v33, 0.0  ;;  %vm432_vm7 = vcmp.gt.f32.partialorder %v431_v33, 0.0 }
 0x16b   : > { %v827_v36 = vpop.f32.mrf.mxu0 }
 0x16c   : > { %v434_v37 = vmul.f32 1.442695, %v433_v35 }
 0x16e   : > { %919 = vpow2.f32 %v434_v37 }
 0x17b   : > { %v920_v38 = vpop.eup %919 }
 0x17c   : > { %v781_v39 = vadd.f32 -1.0, %v920_v38 }
 0x17e   : > { %v437_v40 = vsel %vm432_vm7, %v431_v33, %v781_v39 }
 0x17f   : > { %v438_v41 = vpack.c.bf16 %v437_v40, %v437_v40 }
 0x181   : > { %439 = vst [vmem:[#allocation3 + $0x4] sm:$0xf] %v438_v41 }
 0x188   : > { %v441_v42 = vld [vmem:[#allocation3] sm:$0xff] }
 0x189   : > { %v679_v43 = vld [vmem:[#allocation3 + $0x4] sm:$0xf]  ;;  %v783_v44 = vcombine.low %v441_v42, %v441_v42  ;;  %v784_v45 = vcombine.high %v441_v42, %v441_v42 }
 0x18a   : > { %681 = vst.msk [vmem:[#allocation3] sm:$0xf] %vm252_vm6, %v679_v43  ;;  %v555_v53 = vld [vmem:[#allocation3 + $0x4] sm:$0xf] }
 0x18b   : > { %502 = vrot.lane.b32.xlu0 %v783_v44, %s1006_s12  ;;  %449 = vrot.lane.b32.xlu1 %v783_v44, %s1007_s13  ;;  %v560_v58 = vsel %vm458_vm8, %v555_v53, 0 }
 0x18f   : > { %451 = vrot.lane.b32.xlu1 %v784_v45, %s1007_s13  ;;  %606 = vperm.xlu0 %915, %v1119_v6  }
 0x193   : > { %504 = vrot.lane.b32.xlu1 %v784_v45, %s1006_s12  ;;  %917 = vset.pattern.permute.xlu0 %v1009_v47 }
 0x197   : > { %618 = vperm.xlu1 %916, %v1119_v6  }
 0x1fd   : > { %v450_v48 = vpop.permute.xlu1 %449  ;;  %v503_v54 = vpop.permute.xlu0 %502 }
 0x201   : > { %v452_v49 = vpop.permute.xlu1 %451 }
 0x202   : > { %v453_v50 = vsel %vm273_vm2, %v450_v48, %v452_v49 }
 0x203   : > { %v460_v51 = vsel %vm458_vm8, %v453_v50, 0 }
 0x204   : > { %829 = vmatpush3.bf16.msra.mxu1 %v460_v51 }
 0x205   : > { %v505_v55 = vpop.permute.xlu1 %504  ;;  %840 = vmatprep.subr.bf16.mxu1 %v1004_v2 }
 0x206   : > { %v506_v56 = vsel %vm327_vm3, %v503_v54, %v505_v55 }
 0x207   : > { %v511_v57 = vsel %vm458_vm8, %v506_v56, 0  ;;  %831 = vmatmul.mubr.msk.bf16.vlgmr.msra.gmra.mxu1 %vm454_vm9, %v782_v52 }
 0x208   : > { %835 = vmatpush3.bf16.msra.mxu0 %v511_v57  ;;  %841 = vmatpush3.bf16.msra.mxu1 %v560_v58 }
 0x209   : > { %842 = vmatprep.mubr.msk.bf16.mxu1 %vm1005_vm1, %v1004_v2  ;;  %846 = vmatprep.subr.bf16.mxu0 %v1004_v2 }
 0x20a   : > { %v607_v7 = vpop.permute.xlu0 %606 }
 0x20b   : > { %837 = vmatmul.mubr.msk.bf16.vlgmr.msra.gmra.mxu0 %vm454_vm9, %v440_v59 }
 0x20c   : > { %847 = vmatpush3.bf16.msra.mxu0 %v625_v60  ;;  %848 = vmatprep.mubr.msk.bf16.mxu0 %vm1005_vm1, %v1004_v2 }
 0x20f   : > { %843 = vmatmul.mubr.msk.bf16.vlgmr.msra.gmra.mxu1 %vm454_vm9, %v787_v61 }
 0x212   : > { %v619_v21 = vpop.permute.xlu1 %618 }
 0x213   : > { %849 = vmatmul.mubr.msk.bf16.vlgmr.msra.gmra.mxu0 %vm275_vm5, %v616_v62 }
 0x2c7   : > { %v496_v63 = vpop.f32.mrf.mxu1 }
 0x2c9   : > { %v832_v0 = vpop.f32.mrf.mxu1 }
 0x2cb   : > { %v499_v1 = vpop.f32.mrf.mxu1  ;;  %v547_v3 = vpop.f32.mrf.mxu0 }
 0x2cc   : > { %v548_v6 = vadd.f32 %v547_v3, %v496_v63 }
 0x2cd   : > { %v833_v4 = vpop.f32.mrf.mxu1  ;;  %v838_v5 = vpop.f32.mrf.mxu0 }
 0x2cf   : > { %v596_v8 = vpop.f32.mrf.mxu1  ;;  %v550_v9 = vpop.f32.mrf.mxu0 }
 0x2d0   : > { %v602_v10 = vadd.f32 %v596_v8, %v548_v6 }
 0x2d1   : > { %v844_v2 = vpop.f32.mrf.mxu1  ;;  %v839_v11 = vpop.f32.mrf.mxu0 }
 0x2d2   : > { %v609_v12 = vadd.f32 %v607_v7, %v602_v10 }
 0x2d3   : > { %v599_v13 = vpop.f32.mrf.mxu1  ;;  %v661_v14 = vpop.f32.mrf.mxu0 }
 0x2d4   : > { %v611_v15 = vmin.f32 %v609_v12, 0.0  ;;  %v662_v23 = vadd.f32 %v661_v14, %v619_v21  ;;  %vm610_vm10 = vcmp.gt.f32.partialorder %v609_v12, 0.0 }
 0x2d5   : > { %v845_v16 = vpop.f32.mrf.mxu1  ;;  %v850_v17 = vpop.f32.mrf.mxu0 }
 0x2d6   : > { %v612_v18 = vmul.f32 1.442695, %v611_v15 }
 0x2d7   : > { %v664_v19 = vpop.f32.mrf.mxu0 }
 0x2d8   : > { %921 = vpow2.f32 %v612_v18 }
 0x2d9   : > { %v851_v20 = vpop.f32.mrf.mxu0 }
 0x2e5   : > { %v922_v22 = vpop.eup %921 }
 0x2e6   : > { %v789_v24 = vadd.f32 -1.0, %v922_v22 }
 0x2e8   : > { %v615_v25 = vsel %vm610_vm10, %v609_v12, %v789_v24 }
 0x2e9   : > { %v667_v26 = vadd.f32 %v662_v23, %v615_v25 }
 0x2eb   : > { %v669_v27 = vmin.f32 %v667_v26, 0.0  ;;  %vm668_vm11 = vcmp.gt.f32.partialorder %v667_v26, 0.0 }
 0x2ed   : > { %v670_v28 = vmul.f32 1.442695, %v669_v27 }
 0x2ef   : > { %923 = vpow2.f32 %v670_v28 }
 0x2fc   : > { %v924_v29 = vpop.eup %923 }
 0x2fd   : > { %v791_v30 = vadd.f32 -1.0, %v924_v29 }
 0x2ff   : > { %v673_v31 = vsel %vm668_vm11, %v667_v26, %v791_v30 }
 0x300   : > { %v674_v32 = vpack.c.bf16 %v673_v31, %v673_v31 }
 0x302   : > { %675 = vst [vmem:[%s237_s24] sm:$0xf] %v674_v32 }
 0x303   : > { %938 = shalt.err (!%p935_p5)
}
 0x304   : > { %s939_s12 = scalar_lea.hbm %s695_s7, 64  ;;  %s943_s15 = scalar_lea.hbm %s1226_s5, 128 }
 0x305   : > { %p940_p6 = scmp.ne.s32.totalorder %s695_s7, %s939_s12  ;;  %p944_p10 = scmp.lt.s32.totalorder %s695_s7, %s1226_s5 }
 0x306   : > { %p945_p11 = scmp.lt.s32.totalorder %s943_s15, %s939_s12 }
 0x307   : > { %p941_p7 = pnand %p940_p6, %p1081_p4 }
 0x308   : > { %p946_p12 = por %p945_p11, %p944_p10 }
 0x309   : > { %p942_p9 = pneg %p941_p7 }
 0x30b   : > { %p947_p13 = pnand %p946_p12, %p942_p9 }
 0x30d   : > { %950 = shalt.err (!%p947_p13)
}
 0x30e   : > { %852 = dma.vmem_to_hbm [thread:$0]  (%p1081_p4), %s698_s25, 64, %s695_s7, %s683_s8  }
 0x30f PF: > { %p858_p0 = scmp.ge.s32.totalorder %s1001_s23, 2  ;;  %s709_s24 = sand.u32 1, %s981_s18  }
 0x310   : > { %s710_s27 = scalar_lea.sflag [#allocation5], %s709_s24 }
 0x311   : > { %p855_p1 = pnand %p858_p0, %p1088_p8 }
 0x313   : > { %p856_p2 = pneg %p855_p1 }
 0x315   : > { %976 = dma.done.wait (%p856_p2), %s710_s27, 64  }
 0x316   : > { %978 = vsyncadd (%p856_p2), %s710_s27, 4294967232  ;;  %s18_s23 = sadd.s32 1, %s1001_s23   ;;  %s1229_s18 = smov %s985_s19 }
 0x317   : > { %p15_p3 = scmp.ge.s32.totalorder %s18_s23, 4   ;;  %s1230_s19 = smov %s989_s20 }
 0x318   : > { %s1231_s20 = smov %s1094_s6  ;;  %s1232_s21 = smov %s997_s22 }
 0x319   : > { %s1233_s22 = smov %s1235_s26  ;;  %17 = sbr.rel (!%p15_p3) target bundleno = 4 (0x4), region = 83 }
 0x31e   :  { %715 = vsyncpa [#allocation5], 1 }
 0x31f   :  { %717 = vsyncpa [#allocation5 + $0x1], 1 }

</bundles_post_ra>
